<compile_context>
chip_gen: v7x
topology: tpu7x:2x2x1
jax: 0.10.0
libtpu: 0.0.40
codegen_flags: <defaults>
</compile_context>

<pallas_src>
import numpy as np
from typing import NamedTuple, Any

import jax
import jax.numpy as jnp
from jax import lax
from jax.experimental import pallas as pl
from jax.experimental.pallas import tpu as pltpu


def _round_up(x, m):
    return (x + m - 1) // m * m


# ---------------------------------------------------------------------------
# Kernel
# ---------------------------------------------------------------------------
def make_mapping_kernel(latent_dim, num_layers, compute_dtype):
    """Scales are pre-folded into the weights, so the kernel is simply:
    PixelNorm -> (matmul + bias + LeakyReLU) x num_layers."""
    inv_latent = 1.0 / float(latent_dim)

    def kernel(z_ref, w0_ref, b0_ref, wr_ref, br_ref, out_ref):
        # PixelNorm in f32. Padded feature lanes are zero, so sum/latent_dim is the
        # correct mean over the real lanes.
        z = z_ref[...].astype(jnp.float32)
        ms = jnp.sum(z * z, axis=1, keepdims=True) * inv_latent
        z = z * lax.rsqrt(ms + 1e-8)

        # Layer 0: latent -> dlatent. Weight pre-transposed (K first) & pre-scaled.
        h = jnp.dot(z.astype(compute_dtype), w0_ref[...],
                    preferred_element_type=jnp.float32)
        h = h + b0_ref[...]                 # bias already * lr_mul
        h = jnp.maximum(h, 0.2 * h)         # LeakyReLU(0.2): mul + max only

        # Layers 1..num_layers-1: statically unrolled (tiny trip count). The
        # activation is a loop-carried value, cast to bf16 once per layer.
        for i in range(num_layers - 1):
            h = jnp.dot(h.astype(compute_dtype), wr_ref[i],
                        preferred_element_type=jnp.float32)
            h = h + br_ref[i]
            h = jnp.maximum(h, 0.2 * h)

        out_ref[...] = h.astype(out_ref.dtype)

    return kernel


# ---------------------------------------------------------------------------
# One-time host-side parameter prep (cache the result across forward calls)
# ---------------------------------------------------------------------------
class MappingParams(NamedTuple):
    w0_t: jax.Array      # (lat_p, dlat_p)        compute_dtype, pre-transposed & pre-scaled
    b0_p: jax.Array      # (1, dlat_p)            f32, * lr_mul
    wr_t: jax.Array      # (L1, dlat_p, dlat_p)   compute_dtype
    br_p: jax.Array      # (L1, 1, dlat_p)        f32, * lr_mul
    latent_dim: int
    dlatent_dim: int
    num_layers: int
    compute_dtype: Any


def prepare_mapping_params(w0, b0, wr, br, num_layers, *, lr_mul=1.0,
                           compute_dtype=jnp.bfloat16):
    """Transpose (contraction dim first), fold EqualLinear scale into the weights,
    fold lr_mul into the biases, pad feature dims to multiples of 128 and cast the
    matmul operands to compute_dtype. Call once; reuse across forward calls."""
    dlatent_dim, latent_dim = int(w0.shape[0]), int(w0.shape[1])
    f32 = jnp.float32
    scale0 = 1.0 / np.sqrt(latent_dim) * lr_mul
    scale_r = 1.0 / np.sqrt(dlatent_dim) * lr_mul

    lat_p = _round_up(latent_dim, 128)      # lane-dense contraction dim
    dlat_p = _round_up(dlatent_dim, 128)    # lane-dense output dim
    L1 = max(num_layers - 1, 1)             # size-1 dummy keeps shapes static if num_layers==1

    w0_t = jnp.zeros((lat_p, dlat_p), compute_dtype)
    w0_t = w0_t.at[:latent_dim, :dlatent_dim].set(
        (w0.astype(f32).T * scale0).astype(compute_dtype))
    b0_p = jnp.zeros((1, dlat_p), f32)
    b0_p = b0_p.at[0, :dlatent_dim].set(b0.astype(f32) * lr_mul)

    wr_t = jnp.zeros((L1, dlat_p, dlat_p), compute_dtype)
    br_p = jnp.zeros((L1, 1, dlat_p), f32)
    if num_layers > 1:
        wr_t = wr_t.at[:, :dlatent_dim, :dlatent_dim].set(
            (jnp.swapaxes(wr.astype(f32), 1, 2) * scale_r).astype(compute_dtype))
        br_p = br_p.at[:, 0, :dlatent_dim].set(br.astype(f32) * lr_mul)

    return MappingParams(w0_t, b0_p, wr_t, br_p,
                         latent_dim, dlatent_dim, int(num_layers), compute_dtype)


# ---------------------------------------------------------------------------
# Forward
# ---------------------------------------------------------------------------
def _choose_tile_b(B, max_tile_b):
    B8 = _round_up(B, 8)
    if B8 <= 8:
        return B8
    # At least 2 grid steps so v7x's two TensorCores both get a "parallel" slice;
    # cap at max_tile_b (larger tiles amortize per-step overhead, relevant on v5e).
    return min(max_tile_b, _round_up(pl.cdiv(B8, 2), 8))


def mapping_network_apply(params: MappingParams, z, *, max_tile_b=512):
    B, latent_dim = z.shape
    assert latent_dim == params.latent_dim
    f32 = jnp.float32
    compute_dtype = params.compute_dtype
    lat_p, dlat_p = params.w0_t.shape
    L1 = params.wr_t.shape[0]
    num_layers = params.num_layers

    tile_b = _choose_tile_b(B, max_tile_b)
    B_p = _round_up(_round_up(B, 8), tile_b)
    n_steps = B_p // tile_b

    z_p = jnp.zeros((B_p, lat_p), f32)
    z_p = z_p.at[:B, :latent_dim].set(z.astype(f32))

    # ----- VMEM budget --------------------------------------------------------
    # Resident params counted double-buffered (worst case; constant index_maps mean
    # Mosaic will not actually re-DMA them). Streamed z/out tiles double-buffered.
    c_item = jnp.dtype(compute_dtype).itemsize
    resident_once = ((params.w0_t.size + params.wr_t.size) * c_item
                     + (params.b0_p.size + params.br_p.size) * 4)
    resident = 2 * resident_once
    streamed = 2 * tile_b * lat_p * 4 + 2 * tile_b * dlat_p * 4
    act = 3 * tile_b * dlat_p * 4            # f32 activation + bf16 copy headroom
    vmem_bytes = int(min(max(int(1.5 * (resident + streamed + act)) + (2 << 20),
                             8 << 20),
                         48 << 20))          # keep headroom on v7x (64 MiB physical)

    # ----- cost estimate ------------------------------------------------------
    flops = 2 * B_p * (lat_p * dlat_p + (num_layers - 1) * dlat_p * dlat_p)
    bytes_accessed = (z_p.size + B_p * dlat_p) * 4 + resident_once
    cost = pl.CostEstimate(flops=int(flops), transcendentals=int(B_p),
                           bytes_accessed=int(bytes_accessed))

    kernel = make_mapping_kernel(latent_dim, num_layers, compute_dtype)

    out_p = pl.pallas_call(
        kernel,
        out_shape=jax.ShapeDtypeStruct((B_p, dlat_p), f32),
        grid_spec=pltpu.PrefetchScalarGridSpec(
            num_scalar_prefetch=0,
            grid=(n_steps,),
            in_specs=[
                pl.BlockSpec((tile_b, lat_p), lambda i: (i, 0)),          # z tile (streamed)
                pl.BlockSpec((lat_p, dlat_p), lambda i: (0, 0)),          # w0 (resident)
                pl.BlockSpec((1, dlat_p), lambda i: (0, 0)),              # b0 (resident)
                pl.BlockSpec((L1, dlat_p, dlat_p), lambda i: (0, 0, 0)),  # wr (resident)
                pl.BlockSpec((L1, 1, dlat_p), lambda i: (0, 0, 0)),       # br (resident)
            ],
            out_specs=pl.BlockSpec((tile_b, dlat_p), lambda i: (i, 0)),
        ),
        compiler_params=pltpu.CompilerParams(
            dimension_semantics=("parallel",),
            vmem_limit_bytes=vmem_bytes,
        ),
        cost_estimate=cost,
    )(z_p, params.w0_t, params.b0_p, params.wr_t, params.br_p)

    return out_p[:B, :params.dlatent_dim]


def mapping_network_forward(z, w0, b0, wr, br, num_layers, *, lr_mul=1.0,
                            max_tile_b=512, compute_dtype=jnp.bfloat16):
    """Convenience wrapper (prep + apply). For repeated calls, run
    prepare_mapping_params once and reuse it with mapping_network_apply."""
    params = prepare_mapping_params(w0, b0, wr, br, num_layers, lr_mul=lr_mul,
                                    compute_dtype=compute_dtype)
    return mapping_network_apply(params, z, max_tile_b=max_tile_b)


# ---------------------------------------------------------------------------
# Params in the PyTorch EqualLinear layout + f64 reference
# ---------------------------------------------------------------------------
def init_params(key, latent_dim, dlatent_dim, num_layers, lr_mul=1.0):
    """PyTorch inits biases to zero; small random biases here exercise the bias path."""
    keys = jax.random.split(key, 2 * num_layers)
    w0 = jax.random.normal(keys[0], (dlatent_dim, latent_dim), jnp.float32) / lr_mul
    b0 = 0.1 * jax.random.normal(keys[1], (dlatent_dim,), jnp.float32)
    if num_layers > 1:
        wr = jnp.stack(
            [jax.random.normal(keys[2 * i], (dlatent_dim, dlatent_dim), jnp.float32) / lr_mul
             for i in range(1, num_layers)], axis=0)
        br = jnp.stack(
            [0.1 * jax.random.normal(keys[2 * i + 1], (dlatent_dim,), jnp.float32)
             for i in range(1, num_layers)], axis=0)
    else:
        wr = jnp.zeros((0, dlatent_dim, dlatent_dim), jnp.float32)
        br = jnp.zeros((0, dlatent_dim), jnp.float32)
    return w0, b0, wr, br


def reference_forward(z, w0, b0, wr, br, num_layers, lr_mul=1.0):
    """float64 NumPy reference mirroring the PyTorch module exactly."""
    z = np.asarray(z, np.float64)
    w0 = np.asarray(w0, np.float64)
    b0 = np.asarray(b0, np.float64)
    wr = np.asarray(wr, np.float64)
    br = np.asarray(br, np.float64)
    latent_dim = z.shape[1]
    dlatent_dim = w0.shape[0]

    x = z / np.sqrt(np.mean(z ** 2, axis=1, keepdims=True) + 1e-8)
    h = x @ (w0 * (1.0 / np.sqrt(latent_dim) * lr_mul)).T + b0 * lr_mul
    h = np.where(h >= 0, h, 0.2 * h)
    for i in range(num_layers - 1):
        h = h @ (wr[i] * (1.0 / np.sqrt(dlatent_dim) * lr_mul)).T + br[i] * lr_mul
        h = np.where(h >= 0, h, 0.2 * h)
    return h


if __name__ == "__main__":
    B = 8
    latent_dim = 32
    dlatent_dim = 64
    num_layers = 4

    key = jax.random.PRNGKey(0)
    kz, kp = jax.random.split(key)
    z = jax.random.normal(kz, (B, latent_dim), jnp.float32)
    w0, b0, wr, br = init_params(kp, latent_dim, dlatent_dim, num_layers)

    params = prepare_mapping_params(w0, b0, wr, br, num_layers)   # one-time prep
    out = mapping_network_apply(params, z)
    out = jax.block_until_ready(out)

    ref = reference_forward(z, w0, b0, wr, br, num_layers)
    # bf16 MXU operands (scale pre-folded into weights) with f32 accumulation ->
    # bf16-appropriate tolerance against the f64 reference.
    np.testing.assert_allclose(np.asarray(out, np.float64), ref, rtol=5e-2, atol=5e-2)

    assert out.shape == (B, dlatent_dim)
    print("KERNEL_OK")
</pallas_src>

<mosaic_0001>
module attributes {stable_mosaic.version = 11 : i64} {
  func.func @kernel(%arg0: i32, %arg1: memref<8x128xf32, #tpu.memory_space<vmem>>, %arg2: memref<128x128xbf16, #tpu.memory_space<vmem>>, %arg3: memref<1x128xf32, #tpu.memory_space<vmem>>, %arg4: memref<3x128x128xbf16, #tpu.memory_space<vmem>>, %arg5: memref<3x1x128xf32, #tpu.memory_space<vmem>>, %arg6: memref<8x128xf32, #tpu.memory_space<vmem>>) attributes {dimension_semantics = [#tpu.dimension_semantics<parallel>], iteration_bounds = array<i64: 1>, scalar_prefetch = 0 : i64, scratch_operands = 0 : i64, tpu.core_type = #tpu.core_type<tc>, window_params = [{transform_indices = @transform_0, window_bounds = array<i64: 8, 128>}, {pipeline_mode = #tpu.pipeline_mode<synchronous>, transform_indices = @transform_1, window_bounds = array<i64: 128, 128>}, {pipeline_mode = #tpu.pipeline_mode<synchronous>, transform_indices = @transform_2, window_bounds = array<i64: 1, 128>}, {pipeline_mode = #tpu.pipeline_mode<synchronous>, transform_indices = @transform_3, window_bounds = array<i64: 3, 128, 128>}, {pipeline_mode = #tpu.pipeline_mode<synchronous>, transform_indices = @transform_4, window_bounds = array<i64: 3, 1, 128>}, {transform_indices = @transform_5, window_bounds = array<i64: 8, 128>}]} {
    %c0 = arith.constant 0 : index
    %c0_0 = arith.constant 0 : index
    %0 = vector.load %arg1[%c0, %c0_0] : memref<8x128xf32, #tpu.memory_space<vmem>>, vector<8x128xf32>
    %1 = arith.mulf %0, %0 : vector<8x128xf32>
    %cst = arith.constant dense<0.000000e+00> : vector<8xf32>
    %2 = vector.multi_reduction <add>, %1, %cst [1] : vector<8x128xf32> to vector<8xf32>
    %3 = vector.shape_cast %2 : vector<8xf32> to vector<8x1xf32>
    %cst_1 = arith.constant 3.125000e-02 : f32
    %4 = vector.broadcast %cst_1 : f32 to vector<8x1xf32>
    %5 = arith.mulf %3, %4 : vector<8x1xf32>
    %cst_2 = arith.constant 9.99999993E-9 : f32
    %6 = vector.broadcast %cst_2 : f32 to vector<8x1xf32>
    %7 = arith.addf %5, %6 : vector<8x1xf32>
    %8 = math.rsqrt %7 : vector<8x1xf32>
    %9 = vector.broadcast %8 : vector<8x1xf32> to vector<8x128xf32>
    %10 = arith.mulf %0, %9 : vector<8x128xf32>
    %11 = arith.truncf %10 : vector<8x128xf32> to vector<8x128xbf16>
    %c0_3 = arith.constant 0 : index
    %c0_4 = arith.constant 0 : index
    %12 = vector.load %arg2[%c0_3, %c0_4] : memref<128x128xbf16, #tpu.memory_space<vmem>>, vector<128x128xbf16>
    %cst_5 = arith.constant dense<0.000000e+00> : vector<8x128xf32>
    %13 = tpu.matmul %11, %12, %cst_5 {dimension_numbers = #tpu.dot_dimension_numbers<[1], [0], [0], [1], [0, 0, 1, 1], [], []>} : vector<8x128xbf16>, vector<128x128xbf16>, vector<8x128xf32> -> vector<8x128xf32>
    %c0_6 = arith.constant 0 : index
    %c0_7 = arith.constant 0 : index
    %14 = vector.load %arg3[%c0_6, %c0_7] : memref<1x128xf32, #tpu.memory_space<vmem>>, vector<1x128xf32>
    %15 = vector.broadcast %14 : vector<1x128xf32> to vector<8x128xf32>
    %16 = arith.addf %13, %15 : vector<8x128xf32>
    %cst_8 = arith.constant 2.000000e-01 : f32
    %17 = vector.broadcast %cst_8 : f32 to vector<8x128xf32>
    %18 = arith.mulf %17, %16 : vector<8x128xf32>
    %19 = arith.maximumf %16, %18 : vector<8x128xf32>
    %20 = arith.truncf %19 : vector<8x128xf32> to vector<8x128xbf16>
    %c0_9 = arith.constant 0 : index
    %c0_10 = arith.constant 0 : index
    %c0_11 = arith.constant 0 : index
    %21 = vector.load %arg4[%c0_9, %c0_10, %c0_11] : memref<3x128x128xbf16, #tpu.memory_space<vmem>>, vector<1x128x128xbf16>
    %22 = vector.shape_cast %21 : vector<1x128x128xbf16> to vector<128x128xbf16>
    %cst_12 = arith.constant dense<0.000000e+00> : vector<8x128xf32>
    %23 = tpu.matmul %20, %22, %cst_12 {dimension_numbers = #tpu.dot_dimension_numbers<[1], [0], [0], [1], [0, 0, 1, 1], [], []>} : vector<8x128xbf16>, vector<128x128xbf16>, vector<8x128xf32> -> vector<8x128xf32>
    %c0_13 = arith.constant 0 : index
    %c0_14 = arith.constant 0 : index
    %c0_15 = arith.constant 0 : index
    %24 = vector.load %arg5[%c0_13, %c0_14, %c0_15] : memref<3x1x128xf32, #tpu.memory_space<vmem>>, vector<1x1x128xf32>
    %25 = vector.shape_cast %24 : vector<1x1x128xf32> to vector<1x128xf32>
    %26 = vector.broadcast %25 : vector<1x128xf32> to vector<8x128xf32>
    %27 = arith.addf %23, %26 : vector<8x128xf32>
    %cst_16 = arith.constant 2.000000e-01 : f32
    %28 = vector.broadcast %cst_16 : f32 to vector<8x128xf32>
    %29 = arith.mulf %28, %27 : vector<8x128xf32>
    %30 = arith.maximumf %27, %29 : vector<8x128xf32>
    %31 = arith.truncf %30 : vector<8x128xf32> to vector<8x128xbf16>
    %c1 = arith.constant 1 : index
    %c0_17 = arith.constant 0 : index
    %c0_18 = arith.constant 0 : index
    %32 = vector.load %arg4[%c1, %c0_17, %c0_18] : memref<3x128x128xbf16, #tpu.memory_space<vmem>>, vector<1x128x128xbf16>
    %33 = vector.shape_cast %32 : vector<1x128x128xbf16> to vector<128x128xbf16>
    %cst_19 = arith.constant dense<0.000000e+00> : vector<8x128xf32>
    %34 = tpu.matmul %31, %33, %cst_19 {dimension_numbers = #tpu.dot_dimension_numbers<[1], [0], [0], [1], [0, 0, 1, 1], [], []>} : vector<8x128xbf16>, vector<128x128xbf16>, vector<8x128xf32> -> vector<8x128xf32>
    %c1_20 = arith.constant 1 : index
    %c0_21 = arith.constant 0 : index
    %c0_22 = arith.constant 0 : index
    %35 = vector.load %arg5[%c1_20, %c0_21, %c0_22] : memref<3x1x128xf32, #tpu.memory_space<vmem>>, vector<1x1x128xf32>
    %36 = vector.shape_cast %35 : vector<1x1x128xf32> to vector<1x128xf32>
    %37 = vector.broadcast %36 : vector<1x128xf32> to vector<8x128xf32>
    %38 = arith.addf %34, %37 : vector<8x128xf32>
    %cst_23 = arith.constant 2.000000e-01 : f32
    %39 = vector.broadcast %cst_23 : f32 to vector<8x128xf32>
    %40 = arith.mulf %39, %38 : vector<8x128xf32>
    %41 = arith.maximumf %38, %40 : vector<8x128xf32>
    %42 = arith.truncf %41 : vector<8x128xf32> to vector<8x128xbf16>
    %c2 = arith.constant 2 : index
    %c0_24 = arith.constant 0 : index
    %c0_25 = arith.constant 0 : index
    %43 = vector.load %arg4[%c2, %c0_24, %c0_25] : memref<3x128x128xbf16, #tpu.memory_space<vmem>>, vector<1x128x128xbf16>
    %44 = vector.shape_cast %43 : vector<1x128x128xbf16> to vector<128x128xbf16>
    %cst_26 = arith.constant dense<0.000000e+00> : vector<8x128xf32>
    %45 = tpu.matmul %42, %44, %cst_26 {dimension_numbers = #tpu.dot_dimension_numbers<[1], [0], [0], [1], [0, 0, 1, 1], [], []>} : vector<8x128xbf16>, vector<128x128xbf16>, vector<8x128xf32> -> vector<8x128xf32>
    %c2_27 = arith.constant 2 : index
    %c0_28 = arith.constant 0 : index
    %c0_29 = arith.constant 0 : index
    %46 = vector.load %arg5[%c2_27, %c0_28, %c0_29] : memref<3x1x128xf32, #tpu.memory_space<vmem>>, vector<1x1x128xf32>
    %47 = vector.shape_cast %46 : vector<1x1x128xf32> to vector<1x128xf32>
    %48 = vector.broadcast %47 : vector<1x128xf32> to vector<8x128xf32>
    %49 = arith.addf %45, %48 : vector<8x128xf32>
    %cst_30 = arith.constant 2.000000e-01 : f32
    %50 = vector.broadcast %cst_30 : f32 to vector<8x128xf32>
    %51 = arith.mulf %50, %49 : vector<8x128xf32>
    %52 = arith.maximumf %49, %51 : vector<8x128xf32>
    %c0_31 = arith.constant 0 : index
    %c0_32 = arith.constant 0 : index
    %53 = vector.load %arg6[%c0_31, %c0_32] : memref<8x128xf32, #tpu.memory_space<vmem>>, vector<8x128xf32>
    tpu.vector_store %arg6[%c0_31, %c0_32], %52 {strides = array<i32>} : memref<8x128xf32, #tpu.memory_space<vmem>>, vector<8x128xf32>,
    return
  }
  func.func @transform_0(%arg0: i32) -> (i32, i32) {
    %c0_i32 = arith.constant 0 : i32
    %c0_i32_0 = arith.constant 0 : i32
    return %arg0, %c0_i32 : i32, i32
  }
  func.func @transform_1(%arg0: i32) -> (i32, i32) {
    %c0_i32 = arith.constant 0 : i32
    %c0_i32_0 = arith.constant 0 : i32
    %c0_i32_1 = arith.constant 0 : i32
    return %c0_i32, %c0_i32_0 : i32, i32
  }
  func.func @transform_2(%arg0: i32) -> (i32, i32) {
    %c0_i32 = arith.constant 0 : i32
    %c0_i32_0 = arith.constant 0 : i32
    %c0_i32_1 = arith.constant 0 : i32
    return %c0_i32, %c0_i32_0 : i32, i32
  }
  func.func @transform_3(%arg0: i32) -> (i32, i32, i32) {
    %c0_i32 = arith.constant 0 : i32
    %c0_i32_0 = arith.constant 0 : i32
    %c0_i32_1 = arith.constant 0 : i32
    %c0_i32_2 = arith.constant 0 : i32
    return %c0_i32, %c0_i32_0, %c0_i32_1 : i32, i32, i32
  }
  func.func @transform_4(%arg0: i32) -> (i32, i32, i32) {
    %c0_i32 = arith.constant 0 : i32
    %c0_i32_0 = arith.constant 0 : i32
    %c0_i32_1 = arith.constant 0 : i32
    %c0_i32_2 = arith.constant 0 : i32
    return %c0_i32, %c0_i32_0, %c0_i32_1 : i32, i32, i32
  }
  func.func @transform_5(%arg0: i32) -> (i32, i32) {
    %c0_i32 = arith.constant 0 : i32
    %c0_i32_0 = arith.constant 0 : i32
    return %arg0, %c0_i32 : i32, i32
  }
}

</mosaic_0001>

<bundles_post_ra>
// kernel: tpu_custom_call.1
= control target key start
LH: loop header
LB: loop body
LE: loop exit
PB: predicated region body
PF: predicated region fallthrough
CT: control target
= control target key end

     0   :  { %10 = vsyncpa [#allocation3], 0  ;;  %s980_s0 = inlined_call_operand.hbm [shape: f32[8,128], index: 0, kind: input, shape index: {}]   ;;  %s981_s1 = inlined_call_operand.hbm [shape: bf16[128,128], index: 1, kind: input, shape index: {}]   ;;  %s982_s2 = inlined_call_operand.vmem [shape: f32[1,128], index: 2, kind: input, shape index: {}]   ;;  %s983_s3 = inlined_call_operand.hbm [shape: bf16[3,128,128], index: 3, kind: input, shape index: {}]   ;;  %s984_s4 = inlined_call_operand.vmem [shape: f32[3,1,128], index: 4, kind: input, shape index: {}]   ;;  %s985_s5 = inlined_call_operand.hbm [shape: f32[8,128], index: 5, kind: output, shape index: {}]  }
   0x1   :  { %11 = vsyncpa [#allocation6], 0 }
   0x2   :  { %12 = vsyncpa [#allocation4], 0  ;;  %s836_s18 = smov [#allocation5]   ;;  %s742_s22 = scalar_lea.hbm %s981_s1, 1024 }
   0x3   :  { %s28_s19 = sshll.u32 %s836_s18, 4  ;;  %p743_p0 = scmp.ne.s32.totalorder %s981_s1, %s742_s22  ;;  %s29_s19 = int_to_ptr.vmem [resolvable:$true] %s28_s19 }
   0x4   :  { %p746_p1 = scmp.lt.u32.totalorder %s742_s22, %s981_s1 }
   0x6   :  { %p748_p2 = pnand %p746_p1, %p743_p0 }
   0x8   :  { %751 = shalt.err (!%p748_p2)
}
   0x9   :  { %s752_s27 = scalar_lea.vmem %s29_s19, 1024  ;;  %p757_p4 = scmp.lt.s32.totalorder %s29_s19, %s29_s19 }
   0xa   :  { %p753_p3 = scmp.ne.s32.totalorder %s29_s19, %s752_s27  ;;  %p758_p5 = scmp.lt.s32.totalorder %s752_s27, %s752_s27 }
   0xc   :  { %p759_p6 = por %p758_p5, %p757_p4 }
   0xe   :  { %p760_p7 = pnand %p759_p6, %p753_p3 }
  0x10   :  { %763 = shalt.err (!%p760_p7)
}
  0x11   :  { %s837_s28 = smov 64   ;;  %s838_s29 = smov 4  }
  0x12   :  { %34 = dma.hbm_to_vmem [thread:$0]  %s981_s1, 1024, %s29_s19, [#allocation6], %s837_s28, %s837_s28, %s838_s29  }
  0x13   :  { %s839_s7 = smov [#allocation2]   ;;  %s840_s9 = smov [#allocation7]  }
  0x14   :  { %s19_s8 = sshll.u32 %s839_s7, 4  ;;  %s42_s10 = sshll.u32 %s840_s9, 4  ;;  %s20_s8 = int_to_ptr.vmem [resolvable:$true] %s19_s8  ;;  %s43_s10 = int_to_ptr.vmem [resolvable:$true] %s42_s10 }
  0x15   :  { %s764_s13 = scalar_lea.hbm %s980_s0, 128 }
  0x16   :  { %p765_p8 = scmp.ne.s32.totalorder %s980_s0, %s764_s13  ;;  %p768_p9 = scmp.lt.u32.totalorder %s764_s13, %s980_s0 }
  0x18   :  { %p770_p10 = pnand %p768_p9, %p765_p8 }
  0x1a   :  { %773 = shalt.err (!%p770_p10)
}
  0x1b   :  { %s774_s1 = scalar_lea.vmem %s20_s8, 128  ;;  %p779_p12 = scmp.lt.s32.totalorder %s20_s8, %s20_s8 }
  0x1c   :  { %p775_p11 = scmp.ne.s32.totalorder %s20_s8, %s774_s1  ;;  %p780_p13 = scmp.lt.s32.totalorder %s774_s1, %s774_s1 }
  0x1e   :  { %p781_p0 = por %p780_p13, %p779_p12 }
  0x20   :  { %p782_p1 = pnand %p781_p0, %p775_p11 }
  0x22   :  { %785 = shalt.err (!%p782_p1)
}
  0x23   :  { %22 = dma.hbm_to_vmem [thread:$0]  %s980_s0, 128, %s20_s8, [#allocation3]  }
  0x24   :  { %s786_s22 = scalar_lea.hbm %s983_s3, 3072 }
  0x25   :  { %p787_p2 = scmp.ne.s32.totalorder %s983_s3, %s786_s22  ;;  %p790_p3 = scmp.lt.u32.totalorder %s786_s22, %s983_s3 }
  0x27   :  { %p792_p4 = pnand %p790_p3, %p787_p2 }
  0x29   :  { %795 = shalt.err (!%p792_p4)
}
  0x2a   :  { %s796_s27 = scalar_lea.vmem %s43_s10, 3072  ;;  %p801_p6 = scmp.lt.s32.totalorder %s43_s10, %s43_s10 }
  0x2b   :  { %p797_p5 = scmp.ne.s32.totalorder %s43_s10, %s796_s27  ;;  %p802_p7 = scmp.lt.s32.totalorder %s796_s27, %s796_s27 }
  0x2d   :  { %p803_p8 = por %p802_p7, %p801_p6 }
  0x2f   :  { %p804_p9 = pnand %p803_p8, %p797_p5 }
  0x31   :  { %807 = shalt.err (!%p804_p9)
}
  0x32   :  { %48 = dma.hbm_to_vmem [thread:$0]  %s983_s3, 3072, %s43_s10, [#allocation6], %s837_s28, %s837_s28, %s838_s29  }
  0x33   :  { %830 = dma.done.wait [#allocation3], 128  }
  0x34   :  { %831 = vsyncadd [#allocation3], 4294967168 }
  0x35   :  { %832 = dma.done.wait [#allocation6], 4096  }
  0x36   :  { %833 = vsyncadd [#allocation6], 4294963200  ;;  %v841_v0 = vmov 0.0   ;;  %v61_v1 = vld [vmem:[#allocation2] sm:$0xff]  ;;  %v708_v3 = vld [vmem:[#allocation5] sm:$0xff]   ;;  %vm842_vm0 = vmmov 0  }
  0x37   :  { %620 = vmatprep.subr.bf16.mxu0 %v841_v0  ;;  %640 = vmatprep.subr.bf16.mxu1 %v841_v0  ;;  %v62_v2 = vmul.f32 %v61_v1, %v61_v1  ;;  %v709_v4 = vld [vmem:[#allocation5 + $0x8] sm:$0xff]   ;;  %v710_v5 = vld [vmem:[#allocation5 + $0x10] sm:$0xff]   ;;  %v711_v6 = vld [vmem:[#allocation5 + $0x18] sm:$0xff]   ;;  %s843_s10 = smov [#allocation8]  }
  0x38   :  { %621 = vmatpush3.bf16.msra.mxu0 %v708_v3  ;;  %v712_v7 = vld [vmem:[#allocation5 + $0x20] sm:$0xff]   ;;  %v713_v8 = vld [vmem:[#allocation5 + $0x28] sm:$0xff]   ;;  %636 = vmatprep.mubr.msk.bf16.mxu0 %vm842_vm0, %v841_v0  ;;  %v714_v9 = vld [vmem:[#allocation5 + $0x30] sm:$0xff]   ;;  %s536_s11 = sshll.u32 %s843_s10, 4  ;;  %s537_s11 = int_to_ptr.vmem [resolvable:$true] %s536_s11 }
  0x39   :  { %63 = vadd.xlane.f32.xlu0 %v62_v2  ;;  %622 = vmatprep.subr.bf16.mxu0 %v841_v0  ;;  %v715_v10 = vld [vmem:[#allocation5 + $0x38] sm:$0xff]   ;;  %v716_v11 = vld [vmem:[#allocation7] sm:$0xff]   ;;  %v717_v12 = vld [vmem:[#allocation7 + $0x8] sm:$0xff]   ;;  %s808_s12 = scalar_lea.vmem %s537_s11, 128  ;;  %p813_p11 = scmp.lt.s32.totalorder %s537_s11, %s537_s11 }
  0x3a   :  { %656 = vmatprep.mubr.msk.bf16.mxu1 %vm842_vm0, %v841_v0  ;;  %641 = vmatpush3.bf16.msra.mxu1 %v716_v11  ;;  %v718_v13 = vld [vmem:[#allocation7 + $0x10] sm:$0xff]   ;;  %v719_v14 = vld [vmem:[#allocation7 + $0x18] sm:$0xff]   ;;  %v720_v15 = vld [vmem:[#allocation7 + $0x20] sm:$0xff]   ;;  %p809_p10 = scmp.ne.s32.totalorder %s537_s11, %s808_s12  ;;  %p814_p12 = scmp.lt.s32.totalorder %s808_s12, %s808_s12 }
  0x3b   :  { %642 = vmatprep.subr.bf16.mxu1 %v841_v0  ;;  %v721_v16 = vld [vmem:[#allocation7 + $0x28] sm:$0xff]   ;;  %v722_v23 = vld [vmem:[#allocation7 + $0x30] sm:$0xff]   ;;  %v723_v24 = vld [vmem:[#allocation7 + $0x38] sm:$0xff]  }
  0x3c   :  { %623 = vmatpush3.bf16.msra.mxu0 %v709_v4  ;;  %v724_v25 = vld [vmem:[#allocation7 + $0x40] sm:$0xff]   ;;  %v725_v26 = vld [vmem:[#allocation7 + $0x48] sm:$0xff]   ;;  %v726_v27 = vld [vmem:[#allocation7 + $0x50] sm:$0xff]   ;;  %p815_p13 = por %p814_p12, %p813_p11 }
  0x3d   :  { %624 = vmatprep.subr.bf16.mxu0 %v841_v0  ;;  %v727_v28 = vld [vmem:[#allocation7 + $0x58] sm:$0xff]   ;;  %v728_v29 = vld [vmem:[#allocation7 + $0x60] sm:$0xff]   ;;  %v729_v30 = vld [vmem:[#allocation7 + $0x68] sm:$0xff]  }
  0x3e   :  { %643 = vmatpush3.bf16.msra.mxu1 %v717_v12  ;;  %v546_v31 = vld [vmem:[%s982_s2] ss:$0 sm:$0xff]  ;;  %v730_v40 = vld [vmem:[#allocation7 + $0x70] sm:$0xff]   ;;  %v732_v42 = vld [vmem:[#allocation7 + $0x80] sm:$0xff]   ;;  %p816_p0 = pnand %p815_p13, %p809_p10 }
  0x3f   :  { %644 = vmatprep.subr.bf16.mxu1 %v841_v0  ;;  %v731_v41 = vld [vmem:[#allocation7 + $0x78] sm:$0xff]   ;;  %v733_v43 = vld [vmem:[#allocation7 + $0x88] sm:$0xff]   ;;  %v734_v44 = vld [vmem:[#allocation7 + $0x90] sm:$0xff]  }
  0x40   :  { %625 = vmatpush3.bf16.msra.mxu0 %v710_v5  ;;  %v735_v45 = vld [vmem:[#allocation7 + $0x98] sm:$0xff]   ;;  %v736_v46 = vld [vmem:[#allocation7 + $0xa0] sm:$0xff]   ;;  %v737_v47 = vld [vmem:[#allocation7 + $0xa8] sm:$0xff]  }
  0x41   :  { %626 = vmatprep.subr.bf16.mxu0 %v841_v0  ;;  %v555_v48 = vld [vmem:[%s984_s4] ss:$0 sm:$0xff]  ;;  %v738_v57 = vld [vmem:[#allocation7 + $0xb0] sm:$0xff]   ;;  %v565_v59 = vld [vmem:[%s984_s4 + $0x1] ss:$0 sm:$0xff] }
  0x42   :  { %645 = vmatpush3.bf16.msra.mxu1 %v718_v13  ;;  %v739_v58 = vld [vmem:[#allocation7 + $0xb8] sm:$0xff]  }
  0x43   :  { %646 = vmatprep.subr.bf16.mxu1 %v841_v0  ;;  %v575_v5 = vld [vmem:[%s984_s4 + $0x2] ss:$0 sm:$0xff] }
  0x44   :  { %627 = vmatpush3.bf16.msra.mxu0 %v711_v6 }
  0x45   :  { %628 = vmatprep.subr.bf16.mxu0 %v841_v0 }
  0x46   :  { %647 = vmatpush3.bf16.msra.mxu1 %v719_v14 }
  0x47   :  { %648 = vmatprep.subr.bf16.mxu1 %v841_v0 }
  0x48   :  { %629 = vmatpush3.bf16.msra.mxu0 %v712_v7 }
  0x49   :  { %630 = vmatprep.subr.bf16.mxu0 %v841_v0 }
  0x4a   :  { %649 = vmatpush3.bf16.msra.mxu1 %v720_v15 }
  0x4b   :  { %650 = vmatprep.subr.bf16.mxu1 %v841_v0 }
  0x4c   :  { %631 = vmatpush3.bf16.msra.mxu0 %v713_v8 }
  0x4d   :  { %632 = vmatprep.subr.bf16.mxu0 %v841_v0 }
  0x4e   :  { %651 = vmatpush3.bf16.msra.mxu1 %v721_v16 }
  0x4f   :  { %652 = vmatprep.subr.bf16.mxu1 %v841_v0 }
  0x50   :  { %633 = vmatpush3.bf16.msra.mxu0 %v714_v9 }
  0x51   :  { %634 = vmatprep.subr.bf16.mxu0 %v841_v0 }
  0x52   :  { %653 = vmatpush3.bf16.msra.mxu1 %v722_v23 }
  0x53   :  { %654 = vmatprep.subr.bf16.mxu1 %v841_v0 }
  0x54   :  { %635 = vmatpush3.bf16.msra.mxu0 %v715_v10 }
  0x55   :  { %660 = vmatprep.subr.bf16.mxu0 %v841_v0 }
  0x56   :  { %655 = vmatpush3.bf16.msra.mxu1 %v723_v24 }
  0x57   :  { %680 = vmatprep.subr.bf16.mxu1 %v841_v0 }
  0xc6   :  { %v64_v17 = vpop.xlane.xlu0 %63 }
  0xc7   :  { %v65_v18 = vmul.f32 0.03125, %v64_v17 }
  0xc9   :  { %v66_v19 = vadd.f32 1e-08, %v65_v18 }
  0xcb   :  { %740 = vrsqrt.f32 %v66_v19 }
  0xd5   :  { %v741_v20 = vpop.eup %740 }
  0xd6   :  { %v68_v21 = vmul.f32 %v741_v20, %v61_v1 }
  0xd8   :  { %v69_v22 = vpack.c.bf16 %v68_v21, %v68_v21 }
  0xda   :  { %637 = vmatmul.mubr.bf16.vlgmr.msra.gmra.mrb[0].mxu0 %v69_v22 }
  0xdb   :  { %676 = vmatprep.mubr.msk.bf16.mxu0 %vm842_vm0, %v841_v0  ;;  %661 = vmatpush3.bf16.msra.mxu0 %v724_v25 }
  0xdc   :  { %662 = vmatprep.subr.bf16.mxu0 %v841_v0 }
  0xdf   :  { %663 = vmatpush3.bf16.msra.mxu0 %v725_v26 }
  0xe0   :  { %664 = vmatprep.subr.bf16.mxu0 %v841_v0 }
  0xe3   :  { %665 = vmatpush3.bf16.msra.mxu0 %v726_v27 }
  0xe4   :  { %666 = vmatprep.subr.bf16.mxu0 %v841_v0 }
  0xe7   :  { %667 = vmatpush3.bf16.msra.mxu0 %v727_v28 }
  0xe8   :  { %668 = vmatprep.subr.bf16.mxu0 %v841_v0 }
  0xeb   :  { %669 = vmatpush3.bf16.msra.mxu0 %v728_v29 }
  0xec   :  { %670 = vmatprep.subr.bf16.mxu0 %v841_v0 }
  0xef   :  { %671 = vmatpush3.bf16.msra.mxu0 %v729_v30 }
  0xf0   :  { %672 = vmatprep.subr.bf16.mxu0 %v841_v0 }
  0xf3   :  { %673 = vmatpush3.bf16.msra.mxu0 %v730_v40 }
  0xf4   :  { %674 = vmatprep.subr.bf16.mxu0 %v841_v0 }
  0xf7   :  { %675 = vmatpush3.bf16.msra.mxu0 %v731_v41 }
 0x1ad   :  { %v175_v32 = vpop.f32.mrb[0].mxu0 }
 0x1ae   :  { %v176_v33 = vadd.f32 %v546_v31, %v175_v32  ;;  %v638_v34 = vpop.f32.mrb[1].mxu0 }
 0x1af   :  { %v178_v35 = vpop.f32.mrb[2].mxu0 }
 0x1b0   :  { %v181_v36 = vmul.f32 0.2, %v176_v33  ;;  %v639_v37 = vpop.f32.mrb[3].mxu0 }
 0x1b2   :  { %v182_v38 = vmax.f32 %v176_v33, %v181_v36 }
 0x1b4   :  { %v183_v39 = vpack.c.bf16 %v182_v38, %v182_v38 }
 0x1b6   :  { %657 = vmatmul.mubr.bf16.vlgmr.msra.gmra.mrb[0].mxu1 %v183_v39 }
 0x1b7   :  { %696 = vmatprep.mubr.msk.bf16.mxu1 %vm842_vm0, %v841_v0  ;;  %681 = vmatpush3.bf16.msra.mxu1 %v732_v42 }
 0x1b8   :  { %682 = vmatprep.subr.bf16.mxu1 %v841_v0 }
 0x1bb   :  { %683 = vmatpush3.bf16.msra.mxu1 %v733_v43 }
 0x1bc   :  { %684 = vmatprep.subr.bf16.mxu1 %v841_v0 }
 0x1bf   :  { %685 = vmatpush3.bf16.msra.mxu1 %v734_v44 }
 0x1c0   :  { %686 = vmatprep.subr.bf16.mxu1 %v841_v0 }
 0x1c3   :  { %687 = vmatpush3.bf16.msra.mxu1 %v735_v45 }
 0x1c4   :  { %688 = vmatprep.subr.bf16.mxu1 %v841_v0 }
 0x1c7   :  { %689 = vmatpush3.bf16.msra.mxu1 %v736_v46 }
 0x1c8   :  { %690 = vmatprep.subr.bf16.mxu1 %v841_v0 }
 0x1cb   :  { %691 = vmatpush3.bf16.msra.mxu1 %v737_v47 }
 0x1cc   :  { %692 = vmatprep.subr.bf16.mxu1 %v841_v0 }
 0x1cf   :  { %693 = vmatpush3.bf16.msra.mxu1 %v738_v57 }
 0x1d0   :  { %694 = vmatprep.subr.bf16.mxu1 %v841_v0 }
 0x1d3   :  { %695 = vmatpush3.bf16.msra.mxu1 %v739_v58 }
 0x289   :  { %v289_v49 = vpop.f32.mrb[0].mxu1 }
 0x28a   :  { %v290_v50 = vadd.f32 %v555_v48, %v289_v49  ;;  %v658_v51 = vpop.f32.mrb[1].mxu1 }
 0x28b   :  { %v292_v52 = vpop.f32.mrb[2].mxu1 }
 0x28c   :  { %v295_v53 = vmul.f32 0.2, %v290_v50  ;;  %v659_v54 = vpop.f32.mrb[3].mxu1 }
 0x28e   :  { %v296_v55 = vmax.f32 %v290_v50, %v295_v53 }
 0x290   :  { %v297_v56 = vpack.c.bf16 %v296_v55, %v296_v55 }
 0x292   :  { %677 = vmatmul.mubr.bf16.vlgmr.msra.gmra.mrb[4].mxu0 %v297_v56 }
 0x365   :  { %v405_v60 = vpop.f32.mrb[4].mxu0 }
 0x366   :  { %v406_v61 = vadd.f32 %v565_v59, %v405_v60  ;;  %v678_v62 = vpop.f32.mrb[5].mxu0 }
 0x367   :  { %v408_v63 = vpop.f32.mrb[6].mxu0 }
 0x368   :  { %v411_v1 = vmul.f32 0.2, %v406_v61  ;;  %v679_v2 = vpop.f32.mrb[7].mxu0 }
 0x36a   :  { %v412_v3 = vmax.f32 %v406_v61, %v411_v1 }
 0x36c   :  { %v413_v4 = vpack.c.bf16 %v412_v3, %v412_v3 }
 0x36e   :  { %697 = vmatmul.mubr.bf16.vlgmr.msra.gmra.mrb[4].mxu1 %v413_v4 }
 0x441   :  { %v521_v0 = vpop.f32.mrb[4].mxu1 }
 0x442   :  { %v522_v6 = vadd.f32 %v575_v5, %v521_v0  ;;  %v698_v7 = vpop.f32.mrb[5].mxu1 }
 0x443   :  { %v524_v8 = vpop.f32.mrb[6].mxu1 }
 0x444   :  { %v527_v9 = vmul.f32 0.2, %v522_v6  ;;  %v699_v10 = vpop.f32.mrb[7].mxu1 }
 0x446   :  { %v528_v11 = vmax.f32 %v522_v6, %v527_v9 }
 0x448   :  { %529 = vst [vmem:[#allocation8] sm:$0xff] %v528_v11 }
 0x449   :  { %819 = shalt.err (!%p816_p0)
}
 0x44a   :  { %s820_s14 = scalar_lea.hbm %s985_s5, 128 }
 0x44b   :  { %p821_p1 = scmp.ne.s32.totalorder %s985_s5, %s820_s14  ;;  %p824_p2 = scmp.lt.u32.totalorder %s820_s14, %s985_s5 }
 0x44d   :  { %p826_p3 = pnand %p824_p2, %p821_p1 }
 0x44f   :  { %829 = shalt.err (!%p826_p3)
}
 0x450   :  { %539 = dma.vmem_to_hbm [thread:$0]  %s537_s11, 128, %s985_s5, [#allocation4]  }
 0x451   :  { %834 = dma.done.wait [#allocation4], 128  }
 0x452   :  { %835 = vsyncadd [#allocation4], 4294967168 }
 0x453   :  { %543 = vsyncpa [#allocation3], 1 }
 0x454   :  { %544 = vsyncpa [#allocation6], 1 }
 0x455   :  { %545 = vsyncpa [#allocation4], 1 }

</bundles_post_ra>
